<compile_context>
chip_gen: v7x
topology: tpu7x:2x2x1
jax: 0.10.0
libtpu: 0.0.40
codegen_flags: <defaults>
</compile_context>

<pallas_src>
import functools
import math

import jax
import jax.numpy as jnp
from jax.experimental import pallas as pl
from jax.experimental.pallas import tpu as pltpu

_ALPHA = 0.2  # LeakyReLU negative slope (fixed in the PyTorch module)


def _round_up(a, b):
    return ((a + b - 1) // b) * b


def _conv3x3_lrelu_kernel(x_ref, w_ref, b_ref, o_ref, *, stride, hp, ho, wo_pad):
    """Direct 3x3 conv + bias + LeakyReLU(0.2) for one image.

    x_ref: (1, s*s*hp, wp, C_in)      f32   phase-stacked input (unit-stride taps)
    w_ref: (9, C_in, C_out_pad)       bf16  per-tap weight matrices
    b_ref: (1, C_out_pad)             f32
    o_ref: (1, ho*wo_pad, C_out_pad)  f32
    """
    m = ho * wo_pad
    acc = jnp.zeros((m, o_ref.shape[-1]), jnp.float32)
    for kh in range(3):
        for kw in range(3):
            # Phase-decomposed address:
            #   x[ho*s + kh, wo*s + kw] == phase(kh%s, kw%s)[ho + kh//s, wo + kw//s]
            phase = (kh % stride) * stride + (kw % stride)
            row0 = phase * hp + kh // stride
            col0 = kw // stride
            tap = x_ref[0, pl.ds(row0, ho), pl.ds(col0, wo_pad), :]
            # (ho, wo_pad, C_in) -> (ho*wo_pad, C_in): layout-trivial merge because
            # wo_pad % 8 == 0.  bf16 cast feeds the MXU's native single-pass path.
            lhs = tap.reshape(m, tap.shape[-1]).astype(jnp.bfloat16)
            acc = acc + jnp.dot(lhs, w_ref[kh * 3 + kw],
                                preferred_element_type=jnp.float32)
    acc = acc + b_ref[...]                          # (1, C_out_pad) broadcast, f32
    o_ref[0] = jnp.where(acc >= 0.0, acc, _ALPHA * acc).astype(o_ref.dtype)


@functools.partial(jax.jit, static_argnames=("stride",))
def conv_block_forward(x, weight, bias, *, stride):
    """x: (N, C_in, H, W) f32, weight: (C_out, C_in, 3, 3), bias: (C_out,)."""
    N, C_in, H, W = x.shape
    C_out = weight.shape[0]
    assert weight.shape[1:] == (C_in, 3, 3)
    s = int(stride)
    assert H >= 3 and W >= 3
    Ho = (H - 3) // s + 1
    Wo = (W - 3) // s + 1

    C_out_pad = _round_up(C_out, 128)   # lane-dense GEMM N dim, unmasked stores
    Wo_pad = _round_up(Wo, 8)           # sublane-aligned in-kernel reshape

    # ---- wrapper-side phase split (identity for stride=1, ~1x input bytes) ----
    # Phase (ph, pw) image = x[:, ph::s, pw::s, :], cropped/zero-padded to (Hp, Wp);
    # the s*s phases are stacked along H.  Tap (kh, kw) then reads the unit-stride
    # window phase(kh%s, kw%s)[kh//s : kh//s + Ho, kw//s : kw//s + Wo_pad].
    max_off = 2 // s
    Hp = Ho + max_off
    Wp = Wo_pad + max_off
    H_pad = max(H, Hp * s)
    W_pad = max(W, Wp * s)

    x_nhwc = jnp.transpose(x.astype(jnp.float32), (0, 2, 3, 1))       # (N,H,W,C)
    x_nhwc = jnp.pad(x_nhwc, ((0, 0), (0, H_pad - H), (0, W_pad - W), (0, 0)))
    phases = []
    for ph in range(s):
        for pw in range(s):
            phases.append(x_nhwc[:, ph::s, pw::s, :][:, :Hp, :Wp, :])
    x_stack = jnp.concatenate(phases, axis=1) if len(phases) > 1 else phases[0]
    # x_stack: (N, s*s*Hp, Wp, C_in) f32 (kept f32 in HBM; cast to bf16 in-kernel)

    # weight: (C_out, C_in, 3, 3) -> (kh, kw, C_in, C_out) -> (9, C_in, C_out_pad) bf16
    w_taps = jnp.transpose(weight.astype(jnp.float32), (2, 3, 1, 0)).reshape(9, C_in, C_out)
    w_taps = jnp.pad(w_taps, ((0, 0), (0, 0), (0, C_out_pad - C_out))).astype(jnp.bfloat16)
    b_row = jnp.pad(bias.astype(jnp.float32),
                    (0, C_out_pad - C_out)).reshape(1, C_out_pad)

    PH = s * s * Hp
    M_out = Ho * Wo_pad

    kernel = functools.partial(_conv3x3_lrelu_kernel,
                               stride=s, hp=Hp, ho=Ho, wo_pad=Wo_pad)

    # VMEM budget (double-buffered in/out blocks + resident weight/bias) + headroom.
    x_block = PH * Wp * C_in * 4
    o_block = M_out * C_out_pad * 4
    w_bytes = 9 * C_in * C_out_pad * 2
    vmem_needed = 2 * x_block + 2 * o_block + w_bytes + 2 * C_out_pad * 4
    vmem_limit = int(min(64 * 2 ** 20, max(vmem_needed + (4 << 20), 32 * 2 ** 20)))

    cost = pl.CostEstimate(
        flops=2 * N * M_out * 9 * C_in * C_out_pad,
        transcendentals=0,
        bytes_accessed=N * x_block + w_bytes + C_out_pad * 4 + N * o_block,
    )

    out = pl.pallas_call(
        kernel,
        out_shape=jax.ShapeDtypeStruct((N, M_out, C_out_pad), jnp.float32),
        grid_spec=pltpu.PrefetchScalarGridSpec(
            num_scalar_prefetch=0,
            grid=(N,),
            in_specs=[
                pl.BlockSpec((1, PH, Wp, C_in), lambda n: (n, 0, 0, 0)),
                pl.BlockSpec((9, C_in, C_out_pad), lambda n: (0, 0, 0)),
                pl.BlockSpec((1, C_out_pad), lambda n: (0, 0)),
            ],
            out_specs=pl.BlockSpec((1, M_out, C_out_pad), lambda n: (n, 0, 0)),
        ),
        compiler_params=pltpu.CompilerParams(
            dimension_semantics=("parallel",),
            vmem_limit_bytes=vmem_limit,
        ),
        cost_estimate=cost,
    )(x_stack, w_taps, b_row)

    out = out.reshape(N, Ho, Wo_pad, C_out_pad)[:, :, :Wo, :C_out]
    return jnp.transpose(out, (0, 3, 1, 2))  # back to NCHW


class ConvBlock:
    """JAX/Pallas port of the PyTorch ConvBlock (Conv2d 3x3 + LeakyReLU(0.2))."""

    def __init__(self, in_channels, out_channels, stride, *, key):
        self.stride = stride
        bound = 1.0 / math.sqrt(in_channels * 3 * 3)  # PyTorch default init range
        kw_, kb_ = jax.random.split(key)
        self.weight = jax.random.uniform(
            kw_, (out_channels, in_channels, 3, 3),
            minval=-bound, maxval=bound, dtype=jnp.float32)
        self.bias = jax.random.uniform(
            kb_, (out_channels,),
            minval=-bound, maxval=bound, dtype=jnp.float32)

    def __call__(self, x):
        return conv_block_forward(x, self.weight, self.bias, stride=self.stride)


def _reference(x, weight, bias, stride):
    y = jax.lax.conv_general_dilated(
        x, weight, window_strides=(stride, stride), padding="VALID",
        dimension_numbers=("NCHW", "OIHW", "NCHW"),
        precision=jax.lax.Precision.HIGHEST)
    y = y + bias[None, :, None, None]
    return jnp.where(y >= 0.0, y, _ALPHA * y)


def _bf16_operand_reference(x, weight, bias, stride):
    # Same bf16 operand rounding the kernel applies; f32 accumulation.
    xq = x.astype(jnp.bfloat16).astype(jnp.float32)
    wq = weight.astype(jnp.bfloat16).astype(jnp.float32)
    return _reference(xq, wq, bias, stride)


if __name__ == "__main__":
    key = jax.random.PRNGKey(0)
    kx, kp1, kp2 = jax.random.split(key, 3)

    x = jax.random.normal(kx, (2, 4, 16, 16), dtype=jnp.float32)

    cases = (
        (1, kp1, (2, 8, 14, 14)),   # stride=1: (2,4,16,16) -> (2,8,14,14)
        (2, kp2, (2, 8, 7, 7)),     # stride=2: (2,4,16,16) -> (2,8,7,7)
    )
    for stride, bkey, want_shape in cases:
        block = ConvBlock(4, 8, stride=stride, key=bkey)
        y = jax.block_until_ready(block(x))
        assert y.shape == want_shape, (stride, y.shape)

        # Tight check of the kernel math vs. an identically-quantized XLA reference.
        ref_q = _bf16_operand_reference(x, block.weight, block.bias, stride)
        assert jnp.allclose(y, ref_q, rtol=1e-3, atol=1e-3), \
            (stride, float(jnp.max(jnp.abs(y - ref_q))))

        # Loose check against the exact f32 module semantics; the only deviation is
        # bf16 operand rounding (~2^-8 relative per operand).
        ref = _reference(x, block.weight, block.bias, stride)
        assert jnp.allclose(y, ref, rtol=5e-2, atol=5e-2), \
            (stride, float(jnp.max(jnp.abs(y - ref))))

    print("KERNEL_OK")
</pallas_src>

<mosaic_0001>
module attributes {stable_mosaic.version = 11 : i64} {
  func.func @_conv3x3_lrelu_kernel(%arg0: i32, %arg1: memref<1x16x18x4xf32, #tpu.memory_space<vmem>>, %arg2: memref<9x4x128xbf16, #tpu.memory_space<vmem>>, %arg3: memref<1x128xf32, #tpu.memory_space<vmem>>, %arg4: memref<1x224x128xf32, #tpu.memory_space<vmem>>) attributes {dimension_semantics = [#tpu.dimension_semantics<parallel>], iteration_bounds = array<i64: 2>, scalar_prefetch = 0 : i64, scratch_operands = 0 : i64, tpu.core_type = #tpu.core_type<tc>, window_params = [{transform_indices = @transform_0, window_bounds = array<i64: 1, 16, 18, 4>}, {pipeline_mode = #tpu.pipeline_mode<synchronous>, transform_indices = @transform_1, window_bounds = array<i64: 9, 4, 128>}, {pipeline_mode = #tpu.pipeline_mode<synchronous>, transform_indices = @transform_2, window_bounds = array<i64: 1, 128>}, {transform_indices = @transform_3, window_bounds = array<i64: 1, 224, 128>}]} {
    %cst = arith.constant 0.000000e+00 : f32
    %0 = vector.broadcast %cst : f32 to vector<224x128xf32>
    %c0 = arith.constant 0 : index
    %c0_0 = arith.constant 0 : index
    %c0_1 = arith.constant 0 : index
    %c0_2 = arith.constant 0 : index
    %1 = vector.load %arg1[%c0, %c0_0, %c0_1, %c0_2] : memref<1x16x18x4xf32, #tpu.memory_space<vmem>>, vector<1x14x16x4xf32>
    %2 = vector.shape_cast %1 : vector<1x14x16x4xf32> to vector<14x16x4xf32>
    %3 = vector.shape_cast %2 : vector<14x16x4xf32> to vector<224x4xf32>
    %4 = arith.truncf %3 : vector<224x4xf32> to vector<224x4xbf16>
    %c0_3 = arith.constant 0 : index
    %c0_4 = arith.constant 0 : index
    %c0_5 = arith.constant 0 : index
    %5 = vector.load %arg2[%c0_3, %c0_4, %c0_5] : memref<9x4x128xbf16, #tpu.memory_space<vmem>>, vector<1x4x128xbf16>
    %6 = vector.shape_cast %5 : vector<1x4x128xbf16> to vector<4x128xbf16>
    %cst_6 = arith.constant dense<0.000000e+00> : vector<224x128xf32>
    %7 = tpu.matmul %4, %6, %cst_6 {dimension_numbers = #tpu.dot_dimension_numbers<[1], [0], [0], [1], [0, 0, 1, 1], [], []>} : vector<224x4xbf16>, vector<4x128xbf16>, vector<224x128xf32> -> vector<224x128xf32>
    %8 = arith.addf %0, %7 : vector<224x128xf32>
    %c0_7 = arith.constant 0 : index
    %c0_8 = arith.constant 0 : index
    %c1 = arith.constant 1 : index
    %c0_9 = arith.constant 0 : index
    %9 = vector.load %arg1[%c0_7, %c0_8, %c1, %c0_9] : memref<1x16x18x4xf32, #tpu.memory_space<vmem>>, vector<1x14x16x4xf32>
    %10 = vector.shape_cast %9 : vector<1x14x16x4xf32> to vector<14x16x4xf32>
    %11 = vector.shape_cast %10 : vector<14x16x4xf32> to vector<224x4xf32>
    %12 = arith.truncf %11 : vector<224x4xf32> to vector<224x4xbf16>
    %c1_10 = arith.constant 1 : index
    %c0_11 = arith.constant 0 : index
    %c0_12 = arith.constant 0 : index
    %13 = vector.load %arg2[%c1_10, %c0_11, %c0_12] : memref<9x4x128xbf16, #tpu.memory_space<vmem>>, vector<1x4x128xbf16>
    %14 = vector.shape_cast %13 : vector<1x4x128xbf16> to vector<4x128xbf16>
    %cst_13 = arith.constant dense<0.000000e+00> : vector<224x128xf32>
    %15 = tpu.matmul %12, %14, %cst_13 {dimension_numbers = #tpu.dot_dimension_numbers<[1], [0], [0], [1], [0, 0, 1, 1], [], []>} : vector<224x4xbf16>, vector<4x128xbf16>, vector<224x128xf32> -> vector<224x128xf32>
    %16 = arith.addf %8, %15 : vector<224x128xf32>
    %c0_14 = arith.constant 0 : index
    %c0_15 = arith.constant 0 : index
    %c2 = arith.constant 2 : index
    %c0_16 = arith.constant 0 : index
    %17 = vector.load %arg1[%c0_14, %c0_15, %c2, %c0_16] : memref<1x16x18x4xf32, #tpu.memory_space<vmem>>, vector<1x14x16x4xf32>
    %18 = vector.shape_cast %17 : vector<1x14x16x4xf32> to vector<14x16x4xf32>
    %19 = vector.shape_cast %18 : vector<14x16x4xf32> to vector<224x4xf32>
    %20 = arith.truncf %19 : vector<224x4xf32> to vector<224x4xbf16>
    %c2_17 = arith.constant 2 : index
    %c0_18 = arith.constant 0 : index
    %c0_19 = arith.constant 0 : index
    %21 = vector.load %arg2[%c2_17, %c0_18, %c0_19] : memref<9x4x128xbf16, #tpu.memory_space<vmem>>, vector<1x4x128xbf16>
    %22 = vector.shape_cast %21 : vector<1x4x128xbf16> to vector<4x128xbf16>
    %cst_20 = arith.constant dense<0.000000e+00> : vector<224x128xf32>
    %23 = tpu.matmul %20, %22, %cst_20 {dimension_numbers = #tpu.dot_dimension_numbers<[1], [0], [0], [1], [0, 0, 1, 1], [], []>} : vector<224x4xbf16>, vector<4x128xbf16>, vector<224x128xf32> -> vector<224x128xf32>
    %24 = arith.addf %16, %23 : vector<224x128xf32>
    %c0_21 = arith.constant 0 : index
    %c1_22 = arith.constant 1 : index
    %c0_23 = arith.constant 0 : index
    %c0_24 = arith.constant 0 : index
    %25 = vector.load %arg1[%c0_21, %c1_22, %c0_23, %c0_24] : memref<1x16x18x4xf32, #tpu.memory_space<vmem>>, vector<1x14x16x4xf32>
    %26 = vector.shape_cast %25 : vector<1x14x16x4xf32> to vector<14x16x4xf32>
    %27 = vector.shape_cast %26 : vector<14x16x4xf32> to vector<224x4xf32>
    %28 = arith.truncf %27 : vector<224x4xf32> to vector<224x4xbf16>
    %c3 = arith.constant 3 : index
    %c0_25 = arith.constant 0 : index
    %c0_26 = arith.constant 0 : index
    %29 = vector.load %arg2[%c3, %c0_25, %c0_26] : memref<9x4x128xbf16, #tpu.memory_space<vmem>>, vector<1x4x128xbf16>
    %30 = vector.shape_cast %29 : vector<1x4x128xbf16> to vector<4x128xbf16>
    %cst_27 = arith.constant dense<0.000000e+00> : vector<224x128xf32>
    %31 = tpu.matmul %28, %30, %cst_27 {dimension_numbers = #tpu.dot_dimension_numbers<[1], [0], [0], [1], [0, 0, 1, 1], [], []>} : vector<224x4xbf16>, vector<4x128xbf16>, vector<224x128xf32> -> vector<224x128xf32>
    %32 = arith.addf %24, %31 : vector<224x128xf32>
    %c0_28 = arith.constant 0 : index
    %c1_29 = arith.constant 1 : index
    %c1_30 = arith.constant 1 : index
    %c0_31 = arith.constant 0 : index
    %33 = vector.load %arg1[%c0_28, %c1_29, %c1_30, %c0_31] : memref<1x16x18x4xf32, #tpu.memory_space<vmem>>, vector<1x14x16x4xf32>
    %34 = vector.shape_cast %33 : vector<1x14x16x4xf32> to vector<14x16x4xf32>
    %35 = vector.shape_cast %34 : vector<14x16x4xf32> to vector<224x4xf32>
    %36 = arith.truncf %35 : vector<224x4xf32> to vector<224x4xbf16>
    %c4 = arith.constant 4 : index
    %c0_32 = arith.constant 0 : index
    %c0_33 = arith.constant 0 : index
    %37 = vector.load %arg2[%c4, %c0_32, %c0_33] : memref<9x4x128xbf16, #tpu.memory_space<vmem>>, vector<1x4x128xbf16>
    %38 = vector.shape_cast %37 : vector<1x4x128xbf16> to vector<4x128xbf16>
    %cst_34 = arith.constant dense<0.000000e+00> : vector<224x128xf32>
    %39 = tpu.matmul %36, %38, %cst_34 {dimension_numbers = #tpu.dot_dimension_numbers<[1], [0], [0], [1], [0, 0, 1, 1], [], []>} : vector<224x4xbf16>, vector<4x128xbf16>, vector<224x128xf32> -> vector<224x128xf32>
    %40 = arith.addf %32, %39 : vector<224x128xf32>
    %c0_35 = arith.constant 0 : index
    %c1_36 = arith.constant 1 : index
    %c2_37 = arith.constant 2 : index
    %c0_38 = arith.constant 0 : index
    %41 = vector.load %arg1[%c0_35, %c1_36, %c2_37, %c0_38] : memref<1x16x18x4xf32, #tpu.memory_space<vmem>>, vector<1x14x16x4xf32>
    %42 = vector.shape_cast %41 : vector<1x14x16x4xf32> to vector<14x16x4xf32>
    %43 = vector.shape_cast %42 : vector<14x16x4xf32> to vector<224x4xf32>
    %44 = arith.truncf %43 : vector<224x4xf32> to vector<224x4xbf16>
    %c5 = arith.constant 5 : index
    %c0_39 = arith.constant 0 : index
    %c0_40 = arith.constant 0 : index
    %45 = vector.load %arg2[%c5, %c0_39, %c0_40] : memref<9x4x128xbf16, #tpu.memory_space<vmem>>, vector<1x4x128xbf16>
    %46 = vector.shape_cast %45 : vector<1x4x128xbf16> to vector<4x128xbf16>
    %cst_41 = arith.constant dense<0.000000e+00> : vector<224x128xf32>
    %47 = tpu.matmul %44, %46, %cst_41 {dimension_numbers = #tpu.dot_dimension_numbers<[1], [0], [0], [1], [0, 0, 1, 1], [], []>} : vector<224x4xbf16>, vector<4x128xbf16>, vector<224x128xf32> -> vector<224x128xf32>
    %48 = arith.addf %40, %47 : vector<224x128xf32>
    %c0_42 = arith.constant 0 : index
    %c2_43 = arith.constant 2 : index
    %c0_44 = arith.constant 0 : index
    %c0_45 = arith.constant 0 : index
    %49 = vector.load %arg1[%c0_42, %c2_43, %c0_44, %c0_45] : memref<1x16x18x4xf32, #tpu.memory_space<vmem>>, vector<1x14x16x4xf32>
    %50 = vector.shape_cast %49 : vector<1x14x16x4xf32> to vector<14x16x4xf32>
    %51 = vector.shape_cast %50 : vector<14x16x4xf32> to vector<224x4xf32>
    %52 = arith.truncf %51 : vector<224x4xf32> to vector<224x4xbf16>
    %c6 = arith.constant 6 : index
    %c0_46 = arith.constant 0 : index
    %c0_47 = arith.constant 0 : index
    %53 = vector.load %arg2[%c6, %c0_46, %c0_47] : memref<9x4x128xbf16, #tpu.memory_space<vmem>>, vector<1x4x128xbf16>
    %54 = vector.shape_cast %53 : vector<1x4x128xbf16> to vector<4x128xbf16>
    %cst_48 = arith.constant dense<0.000000e+00> : vector<224x128xf32>
    %55 = tpu.matmul %52, %54, %cst_48 {dimension_numbers = #tpu.dot_dimension_numbers<[1], [0], [0], [1], [0, 0, 1, 1], [], []>} : vector<224x4xbf16>, vector<4x128xbf16>, vector<224x128xf32> -> vector<224x128xf32>
    %56 = arith.addf %48, %55 : vector<224x128xf32>
    %c0_49 = arith.constant 0 : index
    %c2_50 = arith.constant 2 : index
    %c1_51 = arith.constant 1 : index
    %c0_52 = arith.constant 0 : index
    %57 = vector.load %arg1[%c0_49, %c2_50, %c1_51, %c0_52] : memref<1x16x18x4xf32, #tpu.memory_space<vmem>>, vector<1x14x16x4xf32>
    %58 = vector.shape_cast %57 : vector<1x14x16x4xf32> to vector<14x16x4xf32>
    %59 = vector.shape_cast %58 : vector<14x16x4xf32> to vector<224x4xf32>
    %60 = arith.truncf %59 : vector<224x4xf32> to vector<224x4xbf16>
    %c7 = arith.constant 7 : index
    %c0_53 = arith.constant 0 : index
    %c0_54 = arith.constant 0 : index
    %61 = vector.load %arg2[%c7, %c0_53, %c0_54] : memref<9x4x128xbf16, #tpu.memory_space<vmem>>, vector<1x4x128xbf16>
    %62 = vector.shape_cast %61 : vector<1x4x128xbf16> to vector<4x128xbf16>
    %cst_55 = arith.constant dense<0.000000e+00> : vector<224x128xf32>
    %63 = tpu.matmul %60, %62, %cst_55 {dimension_numbers = #tpu.dot_dimension_numbers<[1], [0], [0], [1], [0, 0, 1, 1], [], []>} : vector<224x4xbf16>, vector<4x128xbf16>, vector<224x128xf32> -> vector<224x128xf32>
    %64 = arith.addf %56, %63 : vector<224x128xf32>
    %c0_56 = arith.constant 0 : index
    %c2_57 = arith.constant 2 : index
    %c2_58 = arith.constant 2 : index
    %c0_59 = arith.constant 0 : index
    %65 = vector.load %arg1[%c0_56, %c2_57, %c2_58, %c0_59] : memref<1x16x18x4xf32, #tpu.memory_space<vmem>>, vector<1x14x16x4xf32>
    %66 = vector.shape_cast %65 : vector<1x14x16x4xf32> to vector<14x16x4xf32>
    %67 = vector.shape_cast %66 : vector<14x16x4xf32> to vector<224x4xf32>
    %68 = arith.truncf %67 : vector<224x4xf32> to vector<224x4xbf16>
    %c8 = arith.constant 8 : index
    %c0_60 = arith.constant 0 : index
    %c0_61 = arith.constant 0 : index
    %69 = vector.load %arg2[%c8, %c0_60, %c0_61] : memref<9x4x128xbf16, #tpu.memory_space<vmem>>, vector<1x4x128xbf16>
    %70 = vector.shape_cast %69 : vector<1x4x128xbf16> to vector<4x128xbf16>
    %cst_62 = arith.constant dense<0.000000e+00> : vector<224x128xf32>
    %71 = tpu.matmul %68, %70, %cst_62 {dimension_numbers = #tpu.dot_dimension_numbers<[1], [0], [0], [1], [0, 0, 1, 1], [], []>} : vector<224x4xbf16>, vector<4x128xbf16>, vector<224x128xf32> -> vector<224x128xf32>
    %72 = arith.addf %64, %71 : vector<224x128xf32>
    %c0_63 = arith.constant 0 : index
    %c0_64 = arith.constant 0 : index
    %73 = vector.load %arg3[%c0_63, %c0_64] : memref<1x128xf32, #tpu.memory_space<vmem>>, vector<1x128xf32>
    %74 = vector.broadcast %73 : vector<1x128xf32> to vector<224x128xf32>
    %75 = arith.addf %72, %74 : vector<224x128xf32>
    %cst_65 = arith.constant 0.000000e+00 : f32
    %76 = vector.broadcast %cst_65 : f32 to vector<224x128xf32>
    %77 = arith.cmpf oge, %75, %76 : vector<224x128xf32>
    %cst_66 = arith.constant 2.000000e-01 : f32
    %78 = vector.broadcast %cst_66 : f32 to vector<224x128xf32>
    %79 = arith.mulf %78, %75 : vector<224x128xf32>
    %80 = arith.select %77, %75, %79 : vector<224x128xi1>, vector<224x128xf32>
    %c0_67 = arith.constant 0 : index
    %c0_68 = arith.constant 0 : index
    %c0_69 = arith.constant 0 : index
    %81 = vector.load %arg4[%c0_67, %c0_68, %c0_69] : memref<1x224x128xf32, #tpu.memory_space<vmem>>, vector<1x224x128xf32>
    %82 = vector.shape_cast %81 : vector<1x224x128xf32> to vector<224x128xf32>
    %83 = vector.shape_cast %80 : vector<224x128xf32> to vector<1x224x128xf32>
    tpu.vector_store %arg4[%c0_67, %c0_68, %c0_69], %83 {strides = array<i32>} : memref<1x224x128xf32, #tpu.memory_space<vmem>>, vector<1x224x128xf32>,
    return
  }
  func.func @transform_0(%arg0: i32) -> (i32, i32, i32, i32) {
    %c0_i32 = arith.constant 0 : i32
    %c0_i32_0 = arith.constant 0 : i32
    %c0_i32_1 = arith.constant 0 : i32
    %c0_i32_2 = arith.constant 0 : i32
    return %arg0, %c0_i32, %c0_i32_0, %c0_i32_1 : i32, i32, i32, i32
  }
  func.func @transform_1(%arg0: i32) -> (i32, i32, i32) {
    %c0_i32 = arith.constant 0 : i32
    %c0_i32_0 = arith.constant 0 : i32
    %c0_i32_1 = arith.constant 0 : i32
    %c0_i32_2 = arith.constant 0 : i32
    return %c0_i32, %c0_i32_0, %c0_i32_1 : i32, i32, i32
  }
  func.func @transform_2(%arg0: i32) -> (i32, i32) {
    %c0_i32 = arith.constant 0 : i32
    %c0_i32_0 = arith.constant 0 : i32
    %c0_i32_1 = arith.constant 0 : i32
    return %c0_i32, %c0_i32_0 : i32, i32
  }
  func.func @transform_3(%arg0: i32) -> (i32, i32, i32) {
    %c0_i32 = arith.constant 0 : i32
    %c0_i32_0 = arith.constant 0 : i32
    %c0_i32_1 = arith.constant 0 : i32
    return %arg0, %c0_i32, %c0_i32_0 : i32, i32, i32
  }
}

</mosaic_0001>

<bundles_post_ra>
// kernel: conv_block_forward.1
= control target key start
LH: loop header
LB: loop body
LE: loop exit
PB: predicated region body
PF: predicated region fallthrough
CT: control target
= control target key end

     0   :  { %s3670_s12 = smov 0   ;;  %s4261_s0 = inlined_call_operand.vmem [shape: f32[2,16,18,4], index: 0, kind: input, shape index: {}]   ;;  %s4262_s1 = inlined_call_operand.vmem [shape: bf16[9,4,128], index: 1, kind: input, shape index: {}]   ;;  %s4263_s2 = inlined_call_operand.vmem [shape: f32[1,128], index: 2, kind: input, shape index: {}]   ;;  %s4264_s3 = inlined_call_operand.vmem [shape: f32[2,224,128], index: 3, kind: output, shape index: {}]  }
   0x1 LB: > { %s2679_s13 = sadd.s32 4294967295, %s3648_s12   ;;  %p2683_p0 = scmp.ge.s32.totalorder %s3648_s12, 1  ;;  %s3648_s12 = sphi %s3670_s12, %s13_s12  }
   0x2   : > { %p137_p1 = scmp.lt.s32.totalorder %s3648_s12, 3 }
   0x4   : > { %p138_p2 = pnand %p2683_p0, %p137_p1 }
   0x5   : > { %vm302_vm0 = vcmask (!%p138_p2), 1041408   ;;  %v3681_v0 = vld [vmem:[%s4262_s1 + $0x8] sm:$0x3] (!%p138_p2)  ;;  %v2686_v1 = vld [vmem:[%s4262_s1 + $0x2] sm:$0x3] (!%p138_p2)  ;;  %p161_p3 = scmp.lt.s32.totalorder (!%p138_p2), %s2679_s13, 1 }
   0x6   : > { %141 = sbr.rel (%p138_p2) target bundleno = 493 (0x1ed), region = 32  ;;  %3626 = vmatprep.subr.msk.bf16.mxu0 (!%p138_p2), %vm302_vm0, %v3681_v0  ;;  %3622 = vmatprep.subr.msk.bf16.mxu1 (!%p138_p2), %vm302_vm0, %v2686_v1  ;;  %v3691_v2 = vsel (!%p138_p2), %vm302_vm0, %v3681_v0, 0  ;;  %v304_v3 = vsel (!%p138_p2), %vm302_vm0, %v2686_v1, 0  ;;  %v2844_v4 = vld [vmem:[%s4262_s1 + $0xa] sm:$0x3] (!%p138_p2)  ;;  %vm259_vm1 = vcmask (!%p138_p2), 31744  }
   0x7   : > { %3247 = vmatpush3.bf16.msra.mxu0 (!%p138_p2), %v3691_v2  ;;  %3127 = vmatpush3.bf16.msra.mxu1 (!%p138_p2), %v304_v3  ;;  %v214_v5 = vld [vmem:[%s4262_s1] sm:$0x3] (!%p138_p2)  ;;  %v1515_v17 = vsel (!%p138_p2), %vm302_vm0, %v2844_v4, 0  ;;  %v2887_v20 = vld [vmem:[%s4262_s1 + $0xc] sm:$0x3] (!%p138_p2) }
   0x8   : > { %3628 = vmatprep.subr.msk.bf16.mxu0 (!%p138_p2), %vm302_vm0, %v2844_v4  ;;  %3623 = vmatprep.subr.msk.bf16.mxu1 (!%p138_p2), %vm302_vm0, %v214_v5  ;;  %v494_v19 = vsel (!%p138_p2), %vm302_vm0, %v214_v5, 0  ;;  %v3738_v21 = vld [vmem:[%s4262_s1 + $0x4] sm:$0x3] (!%p138_p2)  ;;  %v1778_v52 = vsel (!%p138_p2), %vm302_vm0, %v2887_v20, 0  ;;  %v3815_v53 = vld [vmem:[%s4262_s1 + $0xe] sm:$0x3] (!%p138_p2) }
   0xd   : > { %s4266_s13 = smov (!%p161_p3, %s2679_s13), 1 }
   0xe   : > { %s3632_s22 = smul.u32 384, %s4266_s13 }
   0xf   : > { %s3633_s11 = smul.u32 224, %s4266_s13 }
  0x10   : > { %s3709_s25 = scalar_lea.vmem %s4261_s0, %s3632_s22 }
  0x11   : > { %v215_v6 = vld [vmem:[%s3709_s25 + $0x1] sm:$0xff]  ;;  %v216_v7 = vld [vmem:[%s3709_s25 + $0x9] sm:$0xff]  ;;  %v2773_v8 = vld [vmem:[%s3709_s25 + $0x19] sm:$0xff]  ;;  %s4194_s16 = scalar_lea.vmem %s4264_s3, %s3633_s11 }
  0x12   : > { %v243_v9 = vpack.c.bf16 %v216_v7, %v215_v6  ;;  %v2774_v10 = vld [vmem:[%s3709_s25 + $0x21] sm:$0xff]  ;;  %v2775_v11 = vld [vmem:[%s3709_s25 + $0x31] sm:$0xff]  ;;  %v2776_v12 = vld [vmem:[%s3709_s25 + $0x39] sm:$0xff] }
  0x13   : > { %v1194_v13 = vpack.c.bf16 %v2774_v10, %v2773_v8  ;;  %v3717_v14 = vpack.c.bf16 %v2776_v12, %v2775_v11  ;;  %v2777_v15 = vld [vmem:[%s3709_s25 + $0x49] sm:$0xff]  ;;  %v2778_v16 = vld [vmem:[%s3709_s25 + $0x51] sm:$0xff]  ;;  %v2779_v22 = vld [vmem:[%s3709_s25 + $0x61] sm:$0xff] }
  0x14   : > { %3128 = vmatprep.mubr.msk.bf16.mxu1 %vm259_vm1, %v243_v9  ;;  %v3723_v18 = vpack.c.bf16 %v2778_v16, %v2777_v15  ;;  %v2780_v23 = vld [vmem:[%s3709_s25 + $0x69] sm:$0xff]  ;;  %v2781_v24 = vld [vmem:[%s3709_s25 + $0x79] sm:$0xff]  ;;  %v2782_v25 = vld [vmem:[%s3709_s25 + $0x81] sm:$0xff] }
  0x15   : > { %3248 = vmatprep.mubr.msk.bf16.mxu0 %vm259_vm1, %v1194_v13  ;;  %3129 = vmatmul.mubr.msk.bf16.vlgmr.msra.gmra.mrb[0].mxu1 %vm259_vm1, %v1194_v13  ;;  %v3749_v26 = vpack.c.bf16 %v2780_v23, %v2779_v22  ;;  %v3751_v27 = vpack.c.bf16 %v2782_v25, %v2781_v24  ;;  %v2783_v28 = vld [vmem:[%s3709_s25 + $0x91] sm:$0xff]  ;;  %v2784_v29 = vld [vmem:[%s3709_s25 + $0x99] sm:$0xff]  ;;  %v2785_v30 = vld [vmem:[%s3709_s25 + $0xa9] sm:$0xff] }
  0x16   : > { %3249 = vmatmul.mubr.msk.bf16.vlgmr.msra.gmra.mrb[0].mxu0 %vm259_vm1, %v3717_v14  ;;  %3132 = vmatprep.mubr.msk.bf16.mxu1 %vm259_vm1, %v3717_v14  ;;  %v2786_v31 = vld [vmem:[%s3709_s25 + $0xb1] sm:$0xff]  ;;  %v3765_v32 = vpack.c.bf16 %v2784_v29, %v2783_v28  ;;  %v2787_v34 = vld [vmem:[%s3709_s25 + $0xc1] sm:$0xff]  ;;  %v2788_v35 = vld [vmem:[%s3709_s25 + $0xc9] sm:$0xff] }
  0x17   : > { %3277 = vmatpush3.bf16.msra.mxu0 %v1515_v17  ;;  %3252 = vmatprep.mubr.msk.bf16.mxu0 %vm259_vm1, %v3723_v18  ;;  %v3767_v33 = vpack.c.bf16 %v2786_v31, %v2785_v30  ;;  %v2816_v36 = vld [vmem:[%s3709_s25 + $0x1a] sm:$0xff]  ;;  %v2817_v37 = vld [vmem:[%s3709_s25 + $0x22] sm:$0xff]  ;;  %v3781_v38 = vpack.c.bf16 %v2788_v35, %v2787_v34  ;;  %v2818_v42 = vld [vmem:[%s3709_s25 + $0x32] sm:$0xff]  ;;  %v728_v35 = vsel %vm302_vm0, %v3738_v21, 0 }
  0x18   : > { %3157 = vmatpush3.bf16.msra.mxu1 %v494_v19  ;;  %3629 = vmatprep.subr.msk.bf16.mxu0 %vm302_vm0, %v2887_v20  ;;  %v3783_v39 = vpack.c.bf16 %v2817_v37, %v2816_v36  ;;  %v233_v40 = vld [vmem:[%s3709_s25 + $0xd9] sm:$0xff]  ;;  %v234_v41 = vld [vmem:[%s3709_s25 + $0xe1] sm:$0xff]  ;;  %v235_v44 = vld [vmem:[%s3709_s25 + $0xf1] sm:$0xff] }
  0x19   : > { %3624 = vmatprep.subr.msk.bf16.mxu1 %vm302_vm0, %v3738_v21  ;;  %v2819_v43 = vld [vmem:[%s3709_s25 + $0x3a] sm:$0xff]  ;;  %v2820_v46 = vld [vmem:[%s3709_s25 + $0x4a] sm:$0xff]  ;;  %v2821_v47 = vld [vmem:[%s3709_s25 + $0x52] sm:$0xff]  ;;  %v3801_v48 = vpack.c.bf16 %v234_v41, %v233_v40 }
  0x1a   : > { %v236_v45 = vld [vmem:[%s3709_s25 + $0xf9] sm:$0xff]  ;;  %v3803_v49 = vpack.c.bf16 %v2819_v43, %v2818_v42  ;;  %v3807_v51 = vpack.c.bf16 %v2821_v47, %v2820_v46  ;;  %v237_v54 = vld [vmem:[%s3709_s25 + $0x109] sm:$0xff]  ;;  %v238_v55 = vld [vmem:[%s3709_s25 + $0x111] sm:$0xff] }
  0x1b   : > { %v3805_v50 = vpack.c.bf16 %v236_v45, %v235_v44  ;;  %v2822_v56 = vld [vmem:[%s3709_s25 + $0x62] sm:$0xff]  ;;  %v2823_v57 = vld [vmem:[%s3709_s25 + $0x6a] sm:$0xff]  ;;  %v2824_v60 = vld [vmem:[%s3709_s25 + $0x7a] sm:$0xff]  ;;  %v3833_v62 = vpack.c.bf16 %v238_v55, %v237_v54 }
  0x1c   : > { %v239_v58 = vld [vmem:[%s3709_s25 + $0x121] sm:$0xff]  ;;  %v240_v59 = vld [vmem:[%s3709_s25 + $0x129] sm:$0xff]  ;;  %v3835_v63 = vpack.c.bf16 %v2823_v57, %v2822_v56  ;;  %v241_v4 = vld [vmem:[%s3709_s25 + $0x139] sm:$0xff] }
  0x1d   : > { %3133 = vmatmul.mubr.msk.bf16.gmra.mrb[4].mxu1 %vm259_vm1, %v3723_v18  ;;  %v2825_v61 = vld [vmem:[%s3709_s25 + $0x82] sm:$0xff]  ;;  %v3837_v1 = vpack.c.bf16 %v240_v59, %v239_v58  ;;  %v2826_v6 = vld [vmem:[%s3709_s25 + $0x92] sm:$0xff]  ;;  %v2827_v7 = vld [vmem:[%s3709_s25 + $0x9a] sm:$0xff] }
  0x1e   : > { %3253 = vmatmul.mubr.msk.bf16.gmra.mrb[4].mxu0 %vm259_vm1, %v3749_v26  ;;  %3136 = vmatprep.mubr.msk.bf16.mxu1 %vm259_vm1, %v3749_v26  ;;  %v3839_v3 = vpack.c.bf16 %v2825_v61, %v2824_v60  ;;  %v242_v5 = vld [vmem:[%s3709_s25 + $0x141] sm:$0xff]  ;;  %v2828_v10 = vld [vmem:[%s3709_s25 + $0xaa] sm:$0xff]  ;;  %v2829_v11 = vld [vmem:[%s3709_s25 + $0xb2] sm:$0xff]  ;;  %v3859_v13 = vpack.c.bf16 %v2827_v7, %v2826_v6 }
  0x1f   : > { %3256 = vmatprep.mubr.msk.bf16.mxu0 %vm259_vm1, %v3751_v27  ;;  %v172_v8 = vld [vmem:[%s3709_s25] sm:$0xff]  ;;  %v173_v9 = vld [vmem:[%s3709_s25 + $0x8] sm:$0xff]  ;;  %v3857_v12 = vpack.c.bf16 %v242_v5, %v241_v4  ;;  %v3861_v16 = vpack.c.bf16 %v2829_v11, %v2828_v10  ;;  %v174_v17 = vld [vmem:[%s3709_s25 + $0x18] sm:$0xff] }
  0x20   : > { %v200_v15 = vpack.c.bf16 %v173_v9, %v172_v8  ;;  %v175_v19 = vld [vmem:[%s3709_s25 + $0x20] sm:$0xff]  ;;  %v2831_v22 = vld [vmem:[%s3709_s25 + $0xca] sm:$0xff]  ;;  %v177_v24 = vld [vmem:[%s3709_s25 + $0x38] sm:$0xff] }
  0x21   : > { %v2830_v20 = vld [vmem:[%s3709_s25 + $0xc2] sm:$0xff]  ;;  %v176_v23 = vld [vmem:[%s3709_s25 + $0x30] sm:$0xff]  ;;  %v2832_v25 = vld [vmem:[%s3709_s25 + $0xda] sm:$0xff]  ;;  %v3878_v29 = vpack.c.bf16 %v175_v19, %v174_v17 }
  0x22   : > { %v2833_v28 = vld [vmem:[%s3709_s25 + $0xe2] sm:$0xff]  ;;  %v3880_v30 = vpack.c.bf16 %v2831_v22, %v2830_v20  ;;  %v3882_v31 = vpack.c.bf16 %v177_v24, %v176_v23  ;;  %v179_v40 = vld [vmem:[%s3709_s25 + $0x50] sm:$0xff]  ;;  %v2835_v21 = vld [vmem:[%s3709_s25 + $0xfa] sm:$0xff] }
  0x23   : > { %v3884_v34 = vpack.c.bf16 %v2833_v28, %v2832_v25  ;;  %v3893_v36 = vld [vmem:[%s4262_s1 + $0x6] sm:$0x3]  ;;  %v178_v37 = vld [vmem:[%s3709_s25 + $0x48] sm:$0xff]  ;;  %v2834_v41 = vld [vmem:[%s3709_s25 + $0xf2] sm:$0xff] }
  0x24   : > { %v180_v42 = vld [vmem:[%s3709_s25 + $0x60] sm:$0xff]  ;;  %v181_v43 = vld [vmem:[%s3709_s25 + $0x68] sm:$0xff]  ;;  %v2837_v45 = vld [vmem:[%s3709_s25 + $0x112] sm:$0xff]  ;;  %v3911_v46 = vpack.c.bf16 %v179_v40, %v178_v37  ;;  %v3913_v47 = vpack.c.bf16 %v2835_v21, %v2834_v41  ;;  %v2040_v41 = vsel %vm302_vm0, %v3815_v53, 0 }
  0x25   : > { %3137 = vmatmul.mubr.msk.bf16.gmra.mrb[8].mxu1 %vm259_vm1, %v3751_v27  ;;  %v2836_v44 = vld [vmem:[%s3709_s25 + $0x10a] sm:$0xff]  ;;  %v182_v55 = vld [vmem:[%s3709_s25 + $0x78] sm:$0xff]  ;;  %v183_v56 = vld [vmem:[%s3709_s25 + $0x80] sm:$0xff] }
  0x26   : > { %3257 = vmatmul.mubr.msk.bf16.gmra.mrb[8].mxu0 %vm259_vm1, %v3765_v32  ;;  %3140 = vmatprep.mubr.msk.bf16.mxu1 %vm259_vm1, %v3765_v32  ;;  %v3917_v54 = vpack.c.bf16 %v2837_v45, %v2836_v44  ;;  %v2838_v57 = vld [vmem:[%s3709_s25 + $0x122] sm:$0xff]  ;;  %v2839_v58 = vld [vmem:[%s3709_s25 + $0x12a] sm:$0xff]  ;;  %v185_v60 = vld [vmem:[%s3709_s25 + $0x98] sm:$0xff]  ;;  %v3935_v5 = vpack.c.bf16 %v183_v56, %v182_v55 }
  0x27   : > { %3260 = vmatprep.mubr.msk.bf16.mxu0 %vm259_vm1, %v3767_v33  ;;  %v184_v59 = vld [vmem:[%s3709_s25 + $0x90] sm:$0xff]  ;;  %v2840_v61 = vld [vmem:[%s3709_s25 + $0x13a] sm:$0xff]  ;;  %v2841_v4 = vld [vmem:[%s3709_s25 + $0x142] sm:$0xff]  ;;  %v3937_v6 = vpack.c.bf16 %v2839_v58, %v2838_v57 }
  0x28   : > { %v3939_v7 = vpack.c.bf16 %v185_v60, %v184_v59  ;;  %v3941_v8 = vpack.c.bf16 %v2841_v4, %v2840_v61  ;;  %v186_v9 = vld [vmem:[%s3709_s25 + $0xa8] sm:$0xff]  ;;  %v187_v10 = vld [vmem:[%s3709_s25 + $0xb0] sm:$0xff]  ;;  %v188_v17 = vld [vmem:[%s3709_s25 + $0xc0] sm:$0xff]  ;;  %v991_v4 = vsel %vm302_vm0, %v3893_v36, 0 }
  0x29   : > { %v2842_v11 = vld [vmem:[%s3709_s25 + $0x152] sm:$0xff]  ;;  %v189_v19 = vld [vmem:[%s3709_s25 + $0xc8] sm:$0xff]  ;;  %v3957_v20 = vpack.c.bf16 %v187_v10, %v186_v9  ;;  %v191_v25 = vld [vmem:[%s3709_s25 + $0xe0] sm:$0xff] }
  0x2a   : > { %v3961_v23 = vpack.c.bf16 %v189_v19, %v188_v17  ;;  %v190_v24 = vld [vmem:[%s3709_s25 + $0xd8] sm:$0xff]  ;;  %v192_v28 = vld [vmem:[%s3709_s25 + $0xf0] sm:$0xff]  ;;  %v197_v44 = vld [vmem:[%s3709_s25 + $0x128] sm:$0xff] }
  0x2b   : > { %v3975_v37 = vpack.c.bf16 %v191_v25, %v190_v24  ;;  %v2973_v21 = vld [vmem:[%s4262_s1 + $0x10] sm:$0x3]  ;;  %v198_v56 = vld [vmem:[%s3709_s25 + $0x138] sm:$0xff]  ;;  %v199_v57 = vld [vmem:[%s3709_s25 + $0x140] sm:$0xff] }
  0x2c   : > { %v641_v58 = vld [vmem:[%s3709_s25 + $0x2] sm:$0xff]  ;;  %v642_v59 = vld [vmem:[%s3709_s25 + $0xa] sm:$0xff]  ;;  %v4013_v60 = vpack.c.bf16 %v199_v57, %v198_v56 }
  0x2d   : > { %3141 = vmatmul.mubr.msk.bf16.gmra.mrb[12].mxu1 %vm259_vm1, %v3767_v33  ;;  %v669_v61 = vpack.c.bf16 %v642_v59, %v641_v58  ;;  %v2886_v10 = vld [vmem:[%s3709_s25 + $0x170] sm:$0xff] }
  0x2e   : > { %3261 = vmatmul.mubr.msk.bf16.gmra.mrb[12].mxu0 %vm259_vm1, %v3781_v38  ;;  %3144 = vmatprep.mubr.msk.bf16.mxu1 %vm259_vm1, %v3781_v38 }
  0x2f   : > { %3278 = vmatprep.mubr.msk.bf16.mxu0 %vm259_vm1, %v3783_v39 }
  0x35   : > { %3145 = vmatmul.mubr.msk.bf16.gmra.mrb[16].mxu1 %vm259_vm1, %v3801_v48 }
  0x36   : > { %3279 = vmatmul.mubr.msk.bf16.vlgmr.msra.gmra.mrb[0].mxu0 %vm259_vm1, %v3803_v49  ;;  %3148 = vmatprep.mubr.msk.bf16.mxu1 %vm259_vm1, %v3805_v50 }
  0x37   : > { %3307 = vmatpush3.bf16.msra.mxu0 %v1778_v52  ;;  %3282 = vmatprep.mubr.msk.bf16.mxu0 %vm259_vm1, %v3807_v51  ;;  %v3915_v52 = vpack.c.bf16 %v181_v43, %v180_v42  ;;  %v194_v42 = vld [vmem:[%s3709_s25 + $0x108] sm:$0xff]  ;;  %v195_v43 = vld [vmem:[%s3709_s25 + $0x110] sm:$0xff] }
  0x38   : > { %3630 = vmatprep.subr.msk.bf16.mxu0 %vm302_vm0, %v3815_v53  ;;  %v196_v53 = vld [vmem:[%s3709_s25 + $0x120] sm:$0xff]  ;;  %v3997_v45 = vpack.c.bf16 %v195_v43, %v194_v42 }
  0x39   : > { %v3999_v55 = vpack.c.bf16 %v197_v44, %v196_v53 }
  0x3d   : > { %3149 = vmatmul.mubr.msk.bf16.gmra.mrb[20].mxu1 %vm259_vm1, %v3833_v62 }
  0x3e   : > { %3283 = vmatmul.mubr.msk.bf16.gmra.mrb[4].mxu0 %vm259_vm1, %v3835_v63  ;;  %3152 = vmatprep.mubr.msk.bf16.mxu1 %vm259_vm1, %v3837_v1 }
  0x3f   : > { %3286 = vmatprep.mubr.msk.bf16.mxu0 %vm259_vm1, %v3839_v3 }
  0x45   : > { %3153 = vmatmul.mubr.msk.bf16.gmra.mrb[24].mxu1 %vm259_vm1, %v3857_v12 }
  0x46   : > { %3287 = vmatmul.mubr.msk.bf16.gmra.mrb[8].mxu0 %vm259_vm1, %v3859_v13  ;;  %3158 = vmatprep.mubr.msk.bf16.mxu1 %vm259_vm1, %v200_v15  ;;  %v2843_v15 = vld [vmem:[%s3709_s25 + $0x15a] sm:$0xff] }
  0x47   : > { %3290 = vmatprep.mubr.msk.bf16.mxu0 %vm259_vm1, %v3861_v16  ;;  %v3959_v22 = vpack.c.bf16 %v2843_v15, %v2842_v11  ;;  %v2302_v15 = vsel %vm302_vm0, %v2973_v21, 0 }
  0x4d   : > { %3159 = vmatmul.mubr.msk.bf16.vlgmr.msra.gmra.mrb[0].mxu1 %vm259_vm1, %v3878_v29 }
  0x4e   : > { %3291 = vmatmul.mubr.msk.bf16.gmra.mrb[12].mxu0 %vm259_vm1, %v3880_v30  ;;  %3162 = vmatprep.mubr.msk.bf16.mxu1 %vm259_vm1, %v3882_v31 }
  0x4f   : > { %3294 = vmatprep.mubr.msk.bf16.mxu0 %vm259_vm1, %v3884_v34  ;;  %3187 = vmatpush3.bf16.msra.mxu1 %v728_v35  ;;  %v193_v35 = vld [vmem:[%s3709_s25 + $0xf8] sm:$0xff] }
  0x50   : > { %3625 = vmatprep.subr.msk.bf16.mxu1 %vm302_vm0, %v3893_v36  ;;  %v3977_v40 = vpack.c.bf16 %v193_v35, %v192_v28  ;;  %v2884_v36 = vld [vmem:[%s3709_s25 + $0x158] sm:$0xff] }
  0x55   : > { %3163 = vmatmul.mubr.msk.bf16.gmra.mrb[4].mxu1 %vm259_vm1, %v3911_v46 }
  0x56   : > { %3295 = vmatmul.mubr.msk.bf16.gmra.mrb[16].mxu0 %vm259_vm1, %v3913_v47  ;;  %3166 = vmatprep.mubr.msk.bf16.mxu1 %vm259_vm1, %v3915_v52 }
  0x57   : > { %3298 = vmatprep.mubr.msk.bf16.mxu0 %vm259_vm1, %v3917_v54 }
  0x5d   : > { %3167 = vmatmul.mubr.msk.bf16.gmra.mrb[8].mxu1 %vm259_vm1, %v3935_v5 }
  0x5e   : > { %3299 = vmatmul.mubr.msk.bf16.gmra.mrb[20].mxu0 %vm259_vm1, %v3937_v6  ;;  %3170 = vmatprep.mubr.msk.bf16.mxu1 %vm259_vm1, %v3939_v7 }
  0x5f   : > { %3302 = vmatprep.mubr.msk.bf16.mxu0 %vm259_vm1, %v3941_v8 }
  0x65   : > { %3171 = vmatmul.mubr.msk.bf16.gmra.mrb[12].mxu1 %vm259_vm1, %v3957_v20 }
  0x66   : > { %3303 = vmatmul.mubr.msk.bf16.gmra.mrb[24].mxu0 %vm259_vm1, %v3959_v22  ;;  %3174 = vmatprep.mubr.msk.bf16.mxu1 %vm259_vm1, %v3961_v23 }
  0x67   : > { %3308 = vmatprep.mubr.msk.bf16.mxu0 %vm259_vm1, %v3882_v31 }
  0x6d   : > { %3175 = vmatmul.mubr.msk.bf16.gmra.mrb[16].mxu1 %vm259_vm1, %v3975_v37 }
  0x6e   : > { %3309 = vmatmul.mubr.msk.bf16.vlgmr.msra.gmra.mrb[0].mxu0 %vm259_vm1, %v3911_v46  ;;  %3178 = vmatprep.mubr.msk.bf16.mxu1 %vm259_vm1, %v3977_v40 }
  0x6f   : > { %3337 = vmatpush3.bf16.msra.mxu0 %v2040_v41  ;;  %3312 = vmatprep.mubr.msk.bf16.mxu0 %vm259_vm1, %v3915_v52 }
  0x70   : > { %3631 = vmatprep.subr.msk.bf16.mxu0 %vm302_vm0, %v2973_v21 }
  0x75   : > { %3179 = vmatmul.mubr.msk.bf16.gmra.mrb[20].mxu1 %vm259_vm1, %v3997_v45 }
  0x76   : > { %3313 = vmatmul.mubr.msk.bf16.gmra.mrb[4].mxu0 %vm259_vm1, %v3935_v5  ;;  %3182 = vmatprep.mubr.msk.bf16.mxu1 %vm259_vm1, %v3999_v55 }
  0x77   : > { %3316 = vmatprep.mubr.msk.bf16.mxu0 %vm259_vm1, %v3939_v7 }
  0x7d   : > { %3183 = vmatmul.mubr.msk.bf16.gmra.mrb[24].mxu1 %vm259_vm1, %v4013_v60 }
  0x7e   : > { %3317 = vmatmul.mubr.msk.bf16.gmra.mrb[8].mxu0 %vm259_vm1, %v3957_v20  ;;  %3188 = vmatprep.mubr.msk.bf16.mxu1 %vm259_vm1, %v669_v61 }
  0x7f   : > { %3320 = vmatprep.mubr.msk.bf16.mxu0 %vm259_vm1, %v3961_v23 }
  0x85   : > { %3189 = vmatmul.mubr.msk.bf16.vlgmr.msra.gmra.mrb[0].mxu1 %vm259_vm1, %v3783_v39  ;;  %v2883_v39 = vld [vmem:[%s3709_s25 + $0x150] sm:$0xff] }
  0x86   : > { %3321 = vmatmul.mubr.msk.bf16.gmra.mrb[12].mxu0 %vm259_vm1, %v3975_v37  ;;  %3192 = vmatprep.mubr.msk.bf16.mxu1 %vm259_vm1, %v3803_v49  ;;  %v1731_v9 = vpack.c.bf16 %v2884_v36, %v2883_v39 }
  0x87   : > { %3324 = vmatprep.mubr.msk.bf16.mxu0 %vm259_vm1, %v3977_v40  ;;  %3217 = vmatpush3.bf16.msra.mxu1 %v991_v4 }
  0x88   : > { %3627 = vmatprep.subr.msk.bf16.mxu1 %vm302_vm0, %v3681_v0  ;;  %v2885_v0 = vld [vmem:[%s3709_s25 + $0x168] sm:$0xff] }
  0x89   : > { %v1732_v11 = vpack.c.bf16 %v2886_v10, %v2885_v0 }
  0x8d   : > { %3193 = vmatmul.mubr.msk.bf16.gmra.mrb[4].mxu1 %vm259_vm1, %v3807_v51 }
  0x8e   : > { %3325 = vmatmul.mubr.msk.bf16.gmra.mrb[16].mxu0 %vm259_vm1, %v3997_v45  ;;  %3196 = vmatprep.mubr.msk.bf16.mxu1 %vm259_vm1, %v3835_v63 }
  0x8f   : > { %3328 = vmatprep.mubr.msk.bf16.mxu0 %vm259_vm1, %v3999_v55 }
  0x95   : > { %3197 = vmatmul.mubr.msk.bf16.gmra.mrb[8].mxu1 %vm259_vm1, %v3839_v3 }
  0x96   : > { %3329 = vmatmul.mubr.msk.bf16.gmra.mrb[20].mxu0 %vm259_vm1, %v4013_v60  ;;  %3200 = vmatprep.mubr.msk.bf16.mxu1 %vm259_vm1, %v3859_v13 }
  0x97   : > { %3332 = vmatprep.mubr.msk.bf16.mxu0 %vm259_vm1, %v1731_v9 }
  0x9d   : > { %3201 = vmatmul.mubr.msk.bf16.gmra.mrb[12].mxu1 %vm259_vm1, %v3861_v16 }
  0x9e   : > { %3333 = vmatmul.mubr.msk.bf16.gmra.mrb[24].mxu0 %vm259_vm1, %v1732_v11  ;;  %3204 = vmatprep.mubr.msk.bf16.mxu1 %vm259_vm1, %v3880_v30 }
  0x9f   : > { %3338 = vmatprep.mubr.msk.bf16.mxu0 %vm259_vm1, %v3717_v14  ;;  %v2926_v14 = vld [vmem:[%s3709_s25 + $0x151] sm:$0xff] }
  0xa5   : > { %3205 = vmatmul.mubr.msk.bf16.gmra.mrb[16].mxu1 %vm259_vm1, %v3884_v34 }
  0xa6   : > { %3339 = vmatmul.mubr.msk.bf16.vlgmr.msra.gmra.mrb[0].mxu0 %vm259_vm1, %v3723_v18  ;;  %3208 = vmatprep.mubr.msk.bf16.mxu1 %vm259_vm1, %v3913_v47  ;;  %v2927_v18 = vld [vmem:[%s3709_s25 + $0x159] sm:$0xff] }
  0xa7   : > { %3367 = vmatpush3.bf16.msra.mxu0 %v2302_v15  ;;  %3342 = vmatprep.mubr.msk.bf16.mxu0 %vm259_vm1, %v3749_v26  ;;  %v1993_v26 = vpack.c.bf16 %v2927_v18, %v2926_v14 }
  0xad   : > { %3209 = vmatmul.mubr.msk.bf16.gmra.mrb[20].mxu1 %vm259_vm1, %v3917_v54 }
  0xae   : > { %3343 = vmatmul.mubr.msk.bf16.gmra.mrb[4].mxu0 %vm259_vm1, %v3751_v27  ;;  %3212 = vmatprep.mubr.msk.bf16.mxu1 %vm259_vm1, %v3937_v6  ;;  %v2929_v27 = vld [vmem:[%s3709_s25 + $0x171] sm:$0xff] }
  0xaf   : > { %3346 = vmatprep.mubr.msk.bf16.mxu0 %vm259_vm1, %v3765_v32 }
  0xb5   : > { %3213 = vmatmul.mubr.msk.bf16.gmra.mrb[24].mxu1 %vm259_vm1, %v3941_v8 }
  0xb6   : > { %3347 = vmatmul.mubr.msk.bf16.gmra.mrb[8].mxu0 %vm259_vm1, %v3767_v33  ;;  %3218 = vmatprep.mubr.msk.bf16.mxu1 %vm259_vm1, %v3878_v29  ;;  %v2971_v33 = vld [vmem:[%s3709_s25 + $0x16a] sm:$0xff] }
  0xb7   : > { %3350 = vmatprep.mubr.msk.bf16.mxu0 %vm259_vm1, %v3781_v38  ;;  %v2972_v38 = vld [vmem:[%s3709_s25 + $0x172] sm:$0xff] }
  0xbd   : > { %3219 = vmatmul.mubr.msk.bf16.vlgmr.msra.gmra.mrb[0].mxu1 %vm259_vm1, %v3882_v31 }
  0xbe   : > { %3351 = vmatmul.mubr.msk.bf16.gmra.mrb[12].mxu0 %vm259_vm1, %v3801_v48  ;;  %3222 = vmatprep.mubr.msk.bf16.mxu1 %vm259_vm1, %v3911_v46 }
  0xbf   : > { %3354 = vmatprep.mubr.msk.bf16.mxu0 %vm259_vm1, %v3805_v50  ;;  %3397 = vmatpush3.bf16.msra.mxu1 %v3691_v2  ;;  %v2928_v2 = vld [vmem:[%s3709_s25 + $0x169] sm:$0xff] }
  0xc0   : > { %v1994_v32 = vpack.c.bf16 %v2929_v27, %v2928_v2 }
  0xc5   : > { %3223 = vmatmul.mubr.msk.bf16.gmra.mrb[4].mxu1 %vm259_vm1, %v3915_v52 }
  0xc6   : > { %3355 = vmatmul.mubr.msk.bf16.gmra.mrb[16].mxu0 %vm259_vm1, %v3833_v62  ;;  %3226 = vmatprep.mubr.msk.bf16.mxu1 %vm259_vm1, %v3935_v5 }
  0xc7   : > { %3358 = vmatprep.mubr.msk.bf16.mxu0 %vm259_vm1, %v3837_v1 }
  0xcd   : > { %3227 = vmatmul.mubr.msk.bf16.gmra.mrb[8].mxu1 %vm259_vm1, %v3939_v7 }
  0xce   : > { %3359 = vmatmul.mubr.msk.bf16.gmra.mrb[20].mxu0 %vm259_vm1, %v3857_v12  ;;  %3230 = vmatprep.mubr.msk.bf16.mxu1 %vm259_vm1, %v3957_v20 }
  0xcf   : > { %3362 = vmatprep.mubr.msk.bf16.mxu0 %vm259_vm1, %v1993_v26 }
  0xd5   : > { %3231 = vmatmul.mubr.msk.bf16.gmra.mrb[12].mxu1 %vm259_vm1, %v3961_v23 }
  0xd6   : > { %3363 = vmatmul.mubr.msk.bf16.gmra.mrb[24].mxu0 %vm259_vm1, %v1994_v32  ;;  %3234 = vmatprep.mubr.msk.bf16.mxu1 %vm259_vm1, %v3975_v37 }
  0xd7   : > { %3368 = vmatprep.mubr.msk.bf16.mxu0 %vm259_vm1, %v3803_v49 }
  0xdd   : > { %3235 = vmatmul.mubr.msk.bf16.gmra.mrb[16].mxu1 %vm259_vm1, %v3977_v40 }
  0xde   : > { %3369 = vmatmul.mubr.msk.bf16.vlgmr.msra.gmra.mrb[0].mxu0 %vm259_vm1, %v3807_v51  ;;  %3238 = vmatprep.mubr.msk.bf16.mxu1 %vm259_vm1, %v3997_v45 }
  0xdf   : > { %3372 = vmatprep.mubr.msk.bf16.mxu0 %vm259_vm1, %v3835_v63 }
  0xe5   : > { %3239 = vmatmul.mubr.msk.bf16.gmra.mrb[20].mxu1 %vm259_vm1, %v3999_v55 }
  0xe6   : > { %3373 = vmatmul.mubr.msk.bf16.gmra.mrb[4].mxu0 %vm259_vm1, %v3839_v3  ;;  %3242 = vmatprep.mubr.msk.bf16.mxu1 %vm259_vm1, %v4013_v60 }
  0xe7   : > { %3376 = vmatprep.mubr.msk.bf16.mxu0 %vm259_vm1, %v3859_v13 }
  0xed   : > { %3243 = vmatmul.mubr.msk.bf16.gmra.mrb[24].mxu1 %vm259_vm1, %v1731_v9 }
  0xee   : > { %3377 = vmatmul.mubr.msk.bf16.gmra.mrb[8].mxu0 %vm259_vm1, %v3861_v16  ;;  %3264 = vmatprep.mubr.msk.bf16.mxu1 %vm259_vm1, %v3801_v48  ;;  %v2256_v48 = vpack.c.bf16 %v2972_v38, %v2971_v33 }
  0xef   : > { %3380 = vmatprep.mubr.msk.bf16.mxu0 %vm259_vm1, %v3880_v30 }
  0xf5   : > { %3265 = vmatmul.mubr.msk.bf16.vlgmr.msra.gmra.mrb[16].mxu1 %vm259_vm1, %v3805_v50 }
  0xf6   : > { %3381 = vmatmul.mubr.msk.bf16.gmra.mrb[12].mxu0 %vm259_vm1, %v3884_v34  ;;  %3268 = vmatprep.mubr.msk.bf16.mxu1 %vm259_vm1, %v3833_v62 }
  0xf7   : > { %3384 = vmatprep.mubr.msk.bf16.mxu0 %vm259_vm1, %v3913_v47 }
  0xfd   : > { %3269 = vmatmul.mubr.msk.bf16.gmra.mrb[20].mxu1 %vm259_vm1, %v3837_v1 }
  0xfe   : > { %3385 = vmatmul.mubr.msk.bf16.gmra.mrb[16].mxu0 %vm259_vm1, %v3917_v54  ;;  %3272 = vmatprep.mubr.msk.bf16.mxu1 %vm259_vm1, %v3857_v12  ;;  %v4186_v54 = vld [vmem:[%s4263_s2] ss:$0 sm:$0xff] }
  0xff   : > { %3388 = vmatprep.mubr.msk.bf16.mxu0 %vm259_vm1, %v3937_v6 }
 0x105   : > { %3273 = vmatmul.mubr.msk.bf16.gmra.mrb[24].mxu1 %vm259_vm1, %v1993_v26 }
 0x106   : > { %3389 = vmatmul.mubr.msk.bf16.gmra.mrb[20].mxu0 %vm259_vm1, %v3941_v8 }
 0x107   : > { %3392 = vmatprep.mubr.msk.bf16.mxu0 %vm259_vm1, %v3959_v22 }
 0x10e   : > { %3393 = vmatmul.mubr.msk.bf16.gmra.mrb[24].mxu0 %vm259_vm1, %v2256_v48 }
 0x190   : > { %v3220_v49 = vpop.f32.mrb[0].mxu1 }
 0x191   : > { %v1027_v50 = vpop.f32.mrb[1].mxu1 }
 0x192   : > { %v3221_v51 = vpop.f32.mrb[2].mxu1 }
 0x193   : > { %v1030_v62 = vpop.f32.mrb[3].mxu1 }
 0x198   : > { %v3224_v63 = vpop.f32.mrb[4].mxu1 }
 0x199   : > { %v1043_v1 = vpop.f32.mrb[5].mxu1 }
 0x19a   : > { %v3225_v3 = vpop.f32.mrb[6].mxu1 }
 0x19b   : > { %v1046_v12 = vpop.f32.mrb[7].mxu1 }
 0x1a0   : > { %v4167_v13 = vpop.f32.mrb[8].mxu1 }
 0x1a1   : > { %v4169_v16 = vpop.f32.mrb[9].mxu1 }
 0x1a2   : > { %v4171_v29 = vpop.f32.mrb[10].mxu1 }
 0x1a3   : > { %v4173_v30 = vpop.f32.mrb[11].mxu1 }
 0x1a8   : > { %v4175_v31 = vpop.f32.mrb[12].mxu1 }
 0x1a9   : > { %v4177_v34 = vpop.f32.mrb[13].mxu1 }
 0x1aa   : > { %v4179_v46 = vpop.f32.mrb[14].mxu1 }
 0x1ab   : > { %v4181_v47 = vpop.f32.mrb[15].mxu1 }
 0x1b1   : > { %v3370_v52 = vpop.f32.mrb[0].mxu0 }
 0x1b2   : > { %v3398_v5 = vadd.f32 %v3370_v52, %v3220_v49  ;;  %v2338_v6 = vpop.f32.mrb[1].mxu0 }
 0x1b3   : > { %v3399_v7 = vadd.f32 %v2338_v6, %v1027_v50  ;;  %v3371_v8 = vpop.f32.mrb[2].mxu0 }
 0x1b4   : > { %v2486_v17 = vadd.f32 %v3398_v5, %v4186_v54  ;;  %v3400_v19 = vadd.f32 %v3371_v8, %v3221_v51  ;;  %v2341_v20 = vpop.f32.mrb[3].mxu0 }
 0x1b5   : > { %v2484_v22 = vadd.f32 %v3399_v7, %v4186_v54  ;;  %v3401_v23 = vadd.f32 %v2341_v20, %v1030_v62 }
 0x1b6   : > { %vm2514_vm2 = vcmp.ge.f32.partialorder %v2486_v17, 0.0  ;;  %v2542_v24 = vmul.f32 0.2, %v2486_v17  ;;  %v2487_v25 = vadd.f32 %v3400_v19, %v4186_v54 }
 0x1b7   : > { %vm2512_vm3 = vcmp.ge.f32.partialorder %v2484_v22, 0.0  ;;  %v2540_v28 = vmul.f32 0.2, %v2484_v22  ;;  %v2485_v35 = vadd.f32 %v3401_v23, %v4186_v54 }
 0x1b8   : > { %v2570_v37 = vsel %vm2514_vm2, %v2486_v17, %v2542_v24  ;;  %vm2515_vm4 = vcmp.ge.f32.partialorder %v2487_v25, 0.0  ;;  %v2543_v40 = vmul.f32 0.2, %v2487_v25 }
 0x1b9   : > { %2598 = vst [vmem:[%s4194_s16 + $0x10] sm:$0xff] %v2570_v37  ;;  %v2568_v41 = vsel %vm2512_vm3, %v2484_v22, %v2540_v28  ;;  %vm2513_vm5 = vcmp.ge.f32.partialorder %v2485_v35, 0.0  ;;  %v2541_v21 = vmul.f32 0.2, %v2485_v35  ;;  %v3374_v42 = vpop.f32.mrb[4].mxu0 }
 0x1ba   : > { %2596 = vst [vmem:[%s4194_s16] sm:$0xff] %v2568_v41  ;;  %v2571_v43 = vsel %vm2515_vm4, %v2487_v25, %v2543_v40  ;;  %v3402_v53 = vadd.f32 %v3374_v42, %v3224_v63  ;;  %v2354_v44 = vpop.f32.mrb[5].mxu0 }
 0x1bb   : > { %2599 = vst [vmem:[%s4194_s16 + $0x18] sm:$0xff] %v2571_v43  ;;  %v2569_v45 = vsel %vm2513_vm5, %v2485_v35, %v2541_v21  ;;  %v3403_v55 = vadd.f32 %v2354_v44, %v1043_v1  ;;  %v3375_v56 = vpop.f32.mrb[6].mxu0 }
 0x1bc   : > { %2597 = vst [vmem:[%s4194_s16 + $0x8] sm:$0xff] %v2569_v45  ;;  %v2490_v57 = vadd.f32 %v3402_v53, %v4186_v54  ;;  %v3404_v58 = vadd.f32 %v3375_v56, %v3225_v3  ;;  %v2357_v59 = vpop.f32.mrb[7].mxu0 }
 0x1bd   : > { %v2488_v60 = vadd.f32 %v3403_v55, %v4186_v54  ;;  %v3405_v61 = vadd.f32 %v2357_v59, %v1046_v12 }
 0x1be   : > { %vm2518_vm6 = vcmp.ge.f32.partialorder %v2490_v57, 0.0  ;;  %v2546_v4 = vmul.f32 0.2, %v2490_v57  ;;  %v2491_v39 = vadd.f32 %v3404_v58, %v4186_v54 }
 0x1bf   : > { %vm2516_vm7 = vcmp.ge.f32.partialorder %v2488_v60, 0.0  ;;  %v2544_v36 = vmul.f32 0.2, %v2488_v60  ;;  %v2489_v9 = vadd.f32 %v3405_v61, %v4186_v54 }
 0x1c0   : > { %v2574_v0 = vsel %vm2518_vm6, %v2490_v57, %v2546_v4  ;;  %vm2519_vm8 = vcmp.ge.f32.partialorder %v2491_v39, 0.0  ;;  %v2547_v10 = vmul.f32 0.2, %v2491_v39 }
 0x1c1   : > { %2602 = vst [vmem:[%s4194_s16 + $0x30] sm:$0xff] %v2574_v0  ;;  %v2572_v11 = vsel %vm2516_vm7, %v2488_v60, %v2544_v36  ;;  %vm2517_vm9 = vcmp.ge.f32.partialorder %v2489_v9, 0.0  ;;  %v2545_v15 = vmul.f32 0.2, %v2489_v9  ;;  %v3378_v14 = vpop.f32.mrb[8].mxu0 }
 0x1c2   : > { %2600 = vst [vmem:[%s4194_s16 + $0x20] sm:$0xff] %v2572_v11  ;;  %v2575_v18 = vsel %vm2519_vm8, %v2491_v39, %v2547_v10  ;;  %v3406_v26 = vadd.f32 %v3378_v14, %v4167_v13  ;;  %v2370_v2 = vpop.f32.mrb[9].mxu0 }
 0x1c3   : > { %2603 = vst [vmem:[%s4194_s16 + $0x38] sm:$0xff] %v2575_v18  ;;  %v2573_v27 = vsel %vm2517_vm9, %v2489_v9, %v2545_v15  ;;  %v3407_v32 = vadd.f32 %v2370_v2, %v4169_v16  ;;  %v3379_v33 = vpop.f32.mrb[10].mxu0 }
 0x1c4   : > { %2601 = vst [vmem:[%s4194_s16 + $0x28] sm:$0xff] %v2573_v27  ;;  %v2494_v38 = vadd.f32 %v3406_v26, %v4186_v54  ;;  %v3408_v48 = vadd.f32 %v3379_v33, %v4171_v29  ;;  %v2373_v49 = vpop.f32.mrb[11].mxu0 }
 0x1c5   : > { %v2492_v50 = vadd.f32 %v3407_v32, %v4186_v54  ;;  %v3409_v51 = vadd.f32 %v2373_v49, %v4173_v30 }
 0x1c6   : > { %vm2522_vm10 = vcmp.ge.f32.partialorder %v2494_v38, 0.0  ;;  %v2550_v62 = vmul.f32 0.2, %v2494_v38  ;;  %v2495_v63 = vadd.f32 %v3408_v48, %v4186_v54 }
 0x1c7   : > { %vm2520_vm11 = vcmp.ge.f32.partialorder %v2492_v50, 0.0  ;;  %v2548_v1 = vmul.f32 0.2, %v2492_v50  ;;  %v2493_v3 = vadd.f32 %v3409_v51, %v4186_v54 }
 0x1c8   : > { %v2578_v12 = vsel %vm2522_vm10, %v2494_v38, %v2550_v62  ;;  %vm2523_vm12 = vcmp.ge.f32.partialorder %v2495_v63, 0.0  ;;  %v2551_v13 = vmul.f32 0.2, %v2495_v63  ;;  %v3266_v16 = vpop.f32.mrb[16].mxu1 }
 0x1c9   : > { %2606 = vst [vmem:[%s4194_s16 + $0x50] sm:$0xff] %v2578_v12  ;;  %v2576_v29 = vsel %vm2520_vm11, %v2492_v50, %v2548_v1  ;;  %vm2521_vm13 = vcmp.ge.f32.partialorder %v2493_v3, 0.0  ;;  %v2549_v52 = vmul.f32 0.2, %v2493_v3  ;;  %v3382_v30 = vpop.f32.mrb[12].mxu0  ;;  %v1353_v5 = vpop.f32.mrb[17].mxu1 }
 0x1ca   : > { %2604 = vst [vmem:[%s4194_s16 + $0x40] sm:$0xff] %v2576_v29  ;;  %v2579_v6 = vsel %vm2523_vm12, %v2495_v63, %v2551_v13  ;;  %v3410_v7 = vadd.f32 %v3382_v30, %v4175_v31  ;;  %v2386_v8 = vpop.f32.mrb[13].mxu0  ;;  %v3267_v17 = vpop.f32.mrb[18].mxu1 }
 0x1cb   : > { %2607 = vst [vmem:[%s4194_s16 + $0x58] sm:$0xff] %v2579_v6  ;;  %v2577_v19 = vsel %vm2521_vm13, %v2493_v3, %v2549_v52  ;;  %v3411_v20 = vadd.f32 %v2386_v8, %v4177_v34  ;;  %v3383_v22 = vpop.f32.mrb[14].mxu0  ;;  %v1356_v23 = vpop.f32.mrb[19].mxu1 }
 0x1cc   : > { %2605 = vst [vmem:[%s4194_s16 + $0x48] sm:$0xff] %v2577_v19  ;;  %v2498_v24 = vadd.f32 %v3410_v7, %v4186_v54  ;;  %v3412_v25 = vadd.f32 %v3383_v22, %v4179_v46  ;;  %v2389_v28 = vpop.f32.mrb[15].mxu0 }
 0x1cd   : > { %v2496_v35 = vadd.f32 %v3411_v20, %v4186_v54  ;;  %v3413_v37 = vadd.f32 %v2389_v28, %v4181_v47 }
 0x1ce   : > { %vm2526_vm14 = vcmp.ge.f32.partialorder %v2498_v24, 0.0  ;;  %v2554_v31 = vmul.f32 0.2, %v2498_v24  ;;  %v2499_v40 = vadd.f32 %v3412_v25, %v4186_v54 }
 0x1cf   : > { %vm2524_vm15 = vcmp.ge.f32.partialorder %v2496_v35, 0.0  ;;  %v2552_v34 = vmul.f32 0.2, %v2496_v35  ;;  %v2497_v41 = vadd.f32 %v3413_v37, %v4186_v54 }
 0x1d0   : > { %v2582_v21 = vsel %vm2526_vm14, %v2498_v24, %v2554_v31  ;;  %vm2527_vm0 = vcmp.ge.f32.partialorder %v2499_v40, 0.0  ;;  %v2555_v42 = vmul.f32 0.2, %v2499_v40  ;;  %v3270_v43 = vpop.f32.mrb[20].mxu1 }
 0x1d1   : > { %2610 = vst [vmem:[%s4194_s16 + $0x70] sm:$0xff] %v2582_v21  ;;  %v2580_v46 = vsel %vm2524_vm15, %v2496_v35, %v2552_v34  ;;  %vm2525_vm1 = vcmp.ge.f32.partialorder %v2497_v41, 0.0  ;;  %v2553_v53 = vmul.f32 0.2, %v2497_v41  ;;  %v3386_v47 = vpop.f32.mrb[16].mxu0  ;;  %v1369_v44 = vpop.f32.mrb[21].mxu1 }
 0x1d2   : > { %2608 = vst [vmem:[%s4194_s16 + $0x60] sm:$0xff] %v2580_v46  ;;  %v2583_v45 = vsel %vm2527_vm0, %v2499_v40, %v2555_v42  ;;  %v3414_v55 = vadd.f32 %v3386_v47, %v3266_v16  ;;  %v2402_v56 = vpop.f32.mrb[17].mxu0  ;;  %v3271_v57 = vpop.f32.mrb[22].mxu1 }
 0x1d3   : > { %2611 = vst [vmem:[%s4194_s16 + $0x78] sm:$0xff] %v2583_v45  ;;  %v2581_v58 = vsel %vm2525_vm1, %v2497_v41, %v2553_v53  ;;  %v3415_v59 = vadd.f32 %v2402_v56, %v1353_v5  ;;  %v3387_v60 = vpop.f32.mrb[18].mxu0  ;;  %v1372_v61 = vpop.f32.mrb[23].mxu1 }
 0x1d4   : > { %2609 = vst [vmem:[%s4194_s16 + $0x68] sm:$0xff] %v2581_v58  ;;  %v2502_v4 = vadd.f32 %v3414_v55, %v4186_v54  ;;  %v3416_v39 = vadd.f32 %v3387_v60, %v3267_v17  ;;  %v2405_v36 = vpop.f32.mrb[19].mxu0 }
 0x1d5   : > { %v2500_v9 = vadd.f32 %v3415_v59, %v4186_v54  ;;  %v3417_v0 = vadd.f32 %v2405_v36, %v1356_v23 }
 0x1d6   : > { %vm2530_vm2 = vcmp.ge.f32.partialorder %v2502_v4, 0.0  ;;  %v2558_v10 = vmul.f32 0.2, %v2502_v4  ;;  %v2503_v11 = vadd.f32 %v3416_v39, %v4186_v54 }
 0x1d7   : > { %vm2528_vm3 = vcmp.ge.f32.partialorder %v2500_v9, 0.0  ;;  %v2556_v15 = vmul.f32 0.2, %v2500_v9  ;;  %v2501_v14 = vadd.f32 %v3417_v0, %v4186_v54 }
 0x1d8   : > { %v2586_v18 = vsel %vm2530_vm2, %v2502_v4, %v2558_v10  ;;  %vm2531_vm4 = vcmp.ge.f32.partialorder %v2503_v11, 0.0  ;;  %v2559_v26 = vmul.f32 0.2, %v2503_v11  ;;  %v3274_v2 = vpop.f32.mrb[24].mxu1 }
 0x1d9   : > { %2614 = vst [vmem:[%s4194_s16 + $0x90] sm:$0xff] %v2586_v18  ;;  %v2584_v27 = vsel %vm2528_vm3, %v2500_v9, %v2556_v15  ;;  %vm2529_vm5 = vcmp.ge.f32.partialorder %v2501_v14, 0.0  ;;  %v2557_v32 = vmul.f32 0.2, %v2501_v14  ;;  %v3390_v33 = vpop.f32.mrb[20].mxu0  ;;  %v1385_v38 = vpop.f32.mrb[25].mxu1 }
 0x1da   : > { %2612 = vst [vmem:[%s4194_s16 + $0x80] sm:$0xff] %v2584_v27  ;;  %v2587_v48 = vsel %vm2531_vm4, %v2503_v11, %v2559_v26  ;;  %v3418_v49 = vadd.f32 %v3390_v33, %v3270_v43  ;;  %v2418_v50 = vpop.f32.mrb[21].mxu0  ;;  %v3275_v51 = vpop.f32.mrb[26].mxu1 }
 0x1db   : > { %2615 = vst [vmem:[%s4194_s16 + $0x98] sm:$0xff] %v2587_v48  ;;  %v2585_v62 = vsel %vm2529_vm5, %v2501_v14, %v2557_v32  ;;  %v3419_v63 = vadd.f32 %v2418_v50, %v1369_v44  ;;  %v3391_v1 = vpop.f32.mrb[22].mxu0  ;;  %v1388_v3 = vpop.f32.mrb[27].mxu1 }
 0x1dc   : > { %2613 = vst [vmem:[%s4194_s16 + $0x88] sm:$0xff] %v2585_v62  ;;  %v2506_v12 = vadd.f32 %v3418_v49, %v4186_v54  ;;  %v3420_v13 = vadd.f32 %v3391_v1, %v3271_v57  ;;  %v2421_v16 = vpop.f32.mrb[23].mxu0 }
 0x1dd   : > { %v2504_v29 = vadd.f32 %v3419_v63, %v4186_v54  ;;  %v3421_v52 = vadd.f32 %v2421_v16, %v1372_v61 }
 0x1de   : > { %vm2534_vm6 = vcmp.ge.f32.partialorder %v2506_v12, 0.0  ;;  %v2562_v30 = vmul.f32 0.2, %v2506_v12  ;;  %v2507_v5 = vadd.f32 %v3420_v13, %v4186_v54 }
 0x1df   : > { %vm2532_vm7 = vcmp.ge.f32.partialorder %v2504_v29, 0.0  ;;  %v2560_v6 = vmul.f32 0.2, %v2504_v29  ;;  %v2505_v7 = vadd.f32 %v3421_v52, %v4186_v54 }
 0x1e0   : > { %v2590_v8 = vsel %vm2534_vm6, %v2506_v12, %v2562_v30  ;;  %vm2535_vm8 = vcmp.ge.f32.partialorder %v2507_v5, 0.0  ;;  %v2563_v17 = vmul.f32 0.2, %v2507_v5 }
 0x1e1   : > { %2618 = vst [vmem:[%s4194_s16 + $0xb0] sm:$0xff] %v2590_v8  ;;  %v2588_v19 = vsel %vm2532_vm7, %v2504_v29, %v2560_v6  ;;  %vm2533_vm9 = vcmp.ge.f32.partialorder %v2505_v7, 0.0  ;;  %v2561_v20 = vmul.f32 0.2, %v2505_v7  ;;  %v3394_v22 = vpop.f32.mrb[24].mxu0 }
 0x1e2   : > { %2616 = vst [vmem:[%s4194_s16 + $0xa0] sm:$0xff] %v2588_v19  ;;  %v2591_v23 = vsel %vm2535_vm8, %v2507_v5, %v2563_v17  ;;  %v3422_v24 = vadd.f32 %v3394_v22, %v3274_v2  ;;  %v2434_v25 = vpop.f32.mrb[25].mxu0 }
 0x1e3   : > { %2619 = vst [vmem:[%s4194_s16 + $0xb8] sm:$0xff] %v2591_v23  ;;  %v2589_v28 = vsel %vm2533_vm9, %v2505_v7, %v2561_v20  ;;  %v3423_v35 = vadd.f32 %v2434_v25, %v1385_v38  ;;  %v3395_v37 = vpop.f32.mrb[26].mxu0 }
 0x1e4   : > { %2617 = vst [vmem:[%s4194_s16 + $0xa8] sm:$0xff] %v2589_v28  ;;  %v2510_v31 = vadd.f32 %v3422_v24, %v4186_v54  ;;  %v3424_v40 = vadd.f32 %v3395_v37, %v3275_v51  ;;  %v2437_v34 = vpop.f32.mrb[27].mxu0 }
 0x1e5   : > { %v2508_v41 = vadd.f32 %v3423_v35, %v4186_v54  ;;  %v3425_v21 = vadd.f32 %v2437_v34, %v1388_v3 }
 0x1e6   : > { %vm2538_vm10 = vcmp.ge.f32.partialorder %v2510_v31, 0.0  ;;  %v2566_v42 = vmul.f32 0.2, %v2510_v31  ;;  %v2511_v43 = vadd.f32 %v3424_v40, %v4186_v54 }
 0x1e7   : > { %vm2536_vm11 = vcmp.ge.f32.partialorder %v2508_v41, 0.0  ;;  %v2564_v46 = vmul.f32 0.2, %v2508_v41  ;;  %v2509_v53 = vadd.f32 %v3425_v21, %v4186_v54 }
 0x1e8   : > { %v2594_v47 = vsel %vm2538_vm10, %v2510_v31, %v2566_v42  ;;  %vm2539_vm12 = vcmp.ge.f32.partialorder %v2511_v43, 0.0  ;;  %v2567_v44 = vmul.f32 0.2, %v2511_v43 }
 0x1e9   : > { %2622 = vst [vmem:[%s4194_s16 + $0xd0] sm:$0xff] %v2594_v47  ;;  %v2592_v45 = vsel %vm2536_vm11, %v2508_v41, %v2564_v46  ;;  %vm2537_vm13 = vcmp.ge.f32.partialorder %v2509_v53, 0.0  ;;  %v2565_v55 = vmul.f32 0.2, %v2509_v53 }
 0x1ea   : > { %2620 = vst [vmem:[%s4194_s16 + $0xc0] sm:$0xff] %v2592_v45  ;;  %v2595_v56 = vsel %vm2539_vm12, %v2511_v43, %v2567_v44 }
 0x1eb   : > { %2623 = vst [vmem:[%s4194_s16 + $0xd8] sm:$0xff] %v2595_v56  ;;  %v2593_v57 = vsel %vm2537_vm13, %v2509_v53, %v2565_v55 }
 0x1ec   : > { %2621 = vst [vmem:[%s4194_s16 + $0xc8] sm:$0xff] %v2593_v57 }
 0x1ed PF: > { %s13_s12 = sadd.s32 1, %s3648_s12  }
 0x1ee   : > { %p10_p4 = scmp.ge.s32.totalorder %s13_s12, 4  }
 0x1f0   :  { %12 = sbr.rel (!%p10_p4) target bundleno = 1 (0x1), region = 72 }

</bundles_post_ra>
